<compile_context>
chip_gen: v7x
topology: tpu7x:2x2x1
jax: 0.10.0
libtpu: 0.0.40
codegen_flags: <defaults>
</compile_context>

<pallas_src>
import jax
import jax.numpy as jnp
from jax.experimental import pallas as pl
from jax.experimental.pallas import tpu as pltpu

N = 2                     # batch
IMG = 56                  # input spatial size -> (N, 1, 56, 56)
POOLED = 28               # after 2x2 avg pool, stride 2
D_IN = IMG * IMG          # 3136 input pixels
D_POOL = POOLED * POOLED  # 784 flattened pooled pixels (= linear1 in_features)
H1, H2, OUT = 64, 24, 10

# Packed small-parameter buffer layout (f32, shape (PACK_ROWS, PACK_COLS)):
#   rows [ 0:64)  cols [0:24) -> w2 (64, 24)
#   row   64      cols [0:64) -> b1 (1, 64)
#   rows [72:96)  cols [0:10) -> w3 (24, 10)
#   row   96      cols [0:24) -> b2 (1, 24)
#   row   97      cols [0:10) -> b3 (1, 10)
PACK_ROWS, PACK_COLS = 104, 64
_W2_ROW, _B1_ROW, _W3_ROW, _B2_ROW, _B3_ROW = 0, 64, 72, 96, 97


def _forward_kernel(taps_ref, w1_ref, packed_ref, o_ref):
    # In-kernel 2x2/s2 average pool on the VPU.  The wrapper presents the four
    # pool taps along axis 0 (pure layout plumbing), so the pool is just three
    # vector adds and a scale on ~N*784 f32 elements, hidden under the DMA.
    x = 0.25 * (taps_ref[0] + taps_ref[1] + taps_ref[2] + taps_ref[3])  # (N, 784) f32

    # Unpack the consolidated small parameters (static slices, tiny loads).
    w2 = packed_ref[_W2_ROW:_W2_ROW + H1, 0:H2]      # (64, 24) f32
    b1 = packed_ref[_B1_ROW:_B1_ROW + 1, 0:H1]       # (1, 64)  f32
    w3 = packed_ref[_W3_ROW:_W3_ROW + H2, 0:OUT]     # (24, 10) f32
    b2 = packed_ref[_B2_ROW:_B2_ROW + 1, 0:H2]       # (1, 24)  f32
    b3 = packed_ref[_B3_ROW:_B3_ROW + 1, 0:OUT]      # (1, 10)  f32

    # w1 is bf16 in HBM/VMEM; jnp.dot promotes it for an f32-accumulated matmul
    # (no explicit full-weight astype temp in source).  Activations stay f32.
    h1 = jnp.dot(x, w1_ref[...], preferred_element_type=jnp.float32) + b1
    h1 = jnp.maximum(h1, 0.0)                                                   # relu
    h2 = jnp.dot(h1, w2, preferred_element_type=jnp.float32) + b2
    h2 = jnp.maximum(h2, 0.0)                                                   # relu
    o_ref[...] = jnp.dot(h2, w3, preferred_element_type=jnp.float32) + b3


def _full_spec(shape):
    nd = len(shape)
    return pl.BlockSpec(shape, lambda i, _nd=nd: (0,) * _nd)


def model_forward(x_nchw, kernel_params):
    w1, packed = kernel_params
    n = x_nchw.shape[0]

    # Layout plumbing only (no arithmetic moved out of the kernel): expose the
    # four 2x2 pool taps on a leading axis -> (4, N, 784) f32.
    taps = (x_nchw.astype(jnp.float32)
            .reshape(n, POOLED, 2, POOLED, 2)
            .transpose(2, 4, 0, 1, 3)
            .reshape(4, n, D_POOL))

    flops = 2 * n * (D_POOL * H1 + H1 * H2 + H2 * OUT) + n * D_IN  # + pool adds
    bytes_accessed = (taps.size * 4          # input taps (f32)
                      + w1.size * 2          # w1 (bf16)
                      + packed.size * 4      # packed small params (f32)
                      + n * OUT * 4)         # output

    return pl.pallas_call(
        _forward_kernel,
        out_shape=jax.ShapeDtypeStruct((n, OUT), jnp.float32),
        grid=(1,),
        in_specs=[
            _full_spec((4, n, D_POOL)),
            _full_spec((D_POOL, H1)),
            _full_spec((PACK_ROWS, PACK_COLS)),
        ],
        out_specs=_full_spec((n, OUT)),
        compiler_params=pltpu.CompilerParams(
            dimension_semantics=("arbitrary",),
        ),
        cost_estimate=pl.CostEstimate(
            flops=int(flops), transcendentals=0,
            bytes_accessed=int(bytes_accessed)),
    )(taps, w1, packed)


def init_params(key):
    """Deterministic init matching nn.Linear shapes (weights stored transposed).

    Weight values are quantized to bf16-representable values; the kernel keeps
    w1 in bf16 (halving the dominant weight DMA) and packs the tiny params
    (b1, w2, b2, w3, b3) into one f32 buffer; the pure-JAX reference uses the
    identical values in f32, so the comparison is exact up to f32 rounding.
    """
    ks = jax.random.split(key, 6)

    def linear(kw, kb, fan_in, fan_out):
        bound = 1.0 / (fan_in ** 0.5)
        w = jax.random.uniform(kw, (fan_in, fan_out), jnp.float32, -bound, bound)
        w = w.astype(jnp.bfloat16)                     # canonical bf16-exact values
        b = jax.random.uniform(kb, (1, fan_out), jnp.float32, -bound, bound)
        return w, b

    w1, b1 = linear(ks[0], ks[1], D_POOL, H1)   # linear1: 784 -> 64
    w2, b2 = linear(ks[2], ks[3], H1, H2)       # linear2: 64  -> 24
    w3, b3 = linear(ks[4], ks[5], H2, OUT)      # linear3: 24  -> 10

    packed = jnp.zeros((PACK_ROWS, PACK_COLS), jnp.float32)
    packed = packed.at[_W2_ROW:_W2_ROW + H1, 0:H2].set(w2.astype(jnp.float32))
    packed = packed.at[_B1_ROW, 0:H1].set(b1[0])
    packed = packed.at[_W3_ROW:_W3_ROW + H2, 0:OUT].set(w3.astype(jnp.float32))
    packed = packed.at[_B2_ROW, 0:H2].set(b2[0])
    packed = packed.at[_B3_ROW, 0:OUT].set(b3[0])

    kernel_params = (w1, packed)                # w1 stays bf16
    ref_params = (w1.astype(jnp.float32), b1,
                  w2.astype(jnp.float32), b2,
                  w3.astype(jnp.float32), b3)
    return kernel_params, ref_params


def reference_forward(x_nchw, ref_params):
    """Pure-JAX reference mirroring the PyTorch forward."""
    w1, b1, w2, b2, w3, b3 = ref_params
    n = x_nchw.shape[0]
    x = x_nchw.reshape(n, 1, POOLED, 2, POOLED, 2).mean(axis=(3, 5))  # avg_pool2d (2,2), s=2
    x = x.reshape(n, D_POOL)
    h1 = jax.nn.relu(x @ w1 + b1)
    h2 = jax.nn.relu(h1 @ w2 + b2)
    return h2 @ w3 + b3


if __name__ == "__main__":
    key = jax.random.PRNGKey(0)
    k_x, k_p = jax.random.split(key)
    x = jax.random.normal(k_x, (N, 1, IMG, IMG), dtype=jnp.float32)
    kernel_params, ref_params = init_params(k_p)

    out = model_forward(x, kernel_params)
    out = jax.block_until_ready(out)

    ref = reference_forward(x, ref_params)
    assert out.shape == (N, OUT), out.shape
    assert jnp.allclose(out, ref, atol=1e-4, rtol=1e-4), float(jnp.max(jnp.abs(out - ref)))
    print("KERNEL_OK")
</pallas_src>

<mosaic_0001>
module attributes {stable_mosaic.version = 11 : i64} {
  func.func @_forward_kernel(%arg0: i32, %arg1: memref<4x2x784xf32, #tpu.memory_space<vmem>>, %arg2: memref<784x64xbf16, #tpu.memory_space<vmem>>, %arg3: memref<104x64xf32, #tpu.memory_space<vmem>>, %arg4: memref<2x10xf32, #tpu.memory_space<vmem>>) attributes {dimension_semantics = [#tpu.dimension_semantics<arbitrary>], iteration_bounds = array<i64: 1>, scalar_prefetch = 0 : i64, scratch_operands = 0 : i64, tpu.core_type = #tpu.core_type<tc>, window_params = [{pipeline_mode = #tpu.pipeline_mode<synchronous>, transform_indices = @transform_0, window_bounds = array<i64: 4, 2, 784>}, {pipeline_mode = #tpu.pipeline_mode<synchronous>, transform_indices = @transform_1, window_bounds = array<i64: 784, 64>}, {pipeline_mode = #tpu.pipeline_mode<synchronous>, transform_indices = @transform_2, window_bounds = array<i64: 104, 64>}, {pipeline_mode = #tpu.pipeline_mode<synchronous>, transform_indices = @transform_3, window_bounds = array<i64: 2, 10>}]} {
    %c0 = arith.constant 0 : index
    %c0_0 = arith.constant 0 : index
    %c0_1 = arith.constant 0 : index
    %0 = vector.load %arg1[%c0, %c0_0, %c0_1] : memref<4x2x784xf32, #tpu.memory_space<vmem>>, vector<1x2x784xf32>
    %1 = vector.shape_cast %0 : vector<1x2x784xf32> to vector<2x784xf32>
    %c1 = arith.constant 1 : index
    %c0_2 = arith.constant 0 : index
    %c0_3 = arith.constant 0 : index
    %2 = vector.load %arg1[%c1, %c0_2, %c0_3] : memref<4x2x784xf32, #tpu.memory_space<vmem>>, vector<1x2x784xf32>
    %3 = vector.shape_cast %2 : vector<1x2x784xf32> to vector<2x784xf32>
    %4 = arith.addf %1, %3 : vector<2x784xf32>
    %c2 = arith.constant 2 : index
    %c0_4 = arith.constant 0 : index
    %c0_5 = arith.constant 0 : index
    %5 = vector.load %arg1[%c2, %c0_4, %c0_5] : memref<4x2x784xf32, #tpu.memory_space<vmem>>, vector<1x2x784xf32>
    %6 = vector.shape_cast %5 : vector<1x2x784xf32> to vector<2x784xf32>
    %7 = arith.addf %4, %6 : vector<2x784xf32>
    %c3 = arith.constant 3 : index
    %c0_6 = arith.constant 0 : index
    %c0_7 = arith.constant 0 : index
    %8 = vector.load %arg1[%c3, %c0_6, %c0_7] : memref<4x2x784xf32, #tpu.memory_space<vmem>>, vector<1x2x784xf32>
    %9 = vector.shape_cast %8 : vector<1x2x784xf32> to vector<2x784xf32>
    %10 = arith.addf %7, %9 : vector<2x784xf32>
    %cst = arith.constant 2.500000e-01 : f32
    %11 = vector.broadcast %cst : f32 to vector<2x784xf32>
    %12 = arith.mulf %11, %10 : vector<2x784xf32>
    %c0_8 = arith.constant 0 : index
    %c0_9 = arith.constant 0 : index
    %13 = vector.load %arg3[%c0_8, %c0_9] : memref<104x64xf32, #tpu.memory_space<vmem>>, vector<64x24xf32>
    %c64 = arith.constant 64 : index
    %c0_10 = arith.constant 0 : index
    %14 = vector.load %arg3[%c64, %c0_10] : memref<104x64xf32, #tpu.memory_space<vmem>>, vector<1x64xf32>
    %c72 = arith.constant 72 : index
    %c0_11 = arith.constant 0 : index
    %15 = vector.load %arg3[%c72, %c0_11] : memref<104x64xf32, #tpu.memory_space<vmem>>, vector<24x10xf32>
    %c96 = arith.constant 96 : index
    %c0_12 = arith.constant 0 : index
    %16 = vector.load %arg3[%c96, %c0_12] : memref<104x64xf32, #tpu.memory_space<vmem>>, vector<1x24xf32>
    %c97 = arith.constant 97 : index
    %c0_13 = arith.constant 0 : index
    %17 = vector.load %arg3[%c97, %c0_13] : memref<104x64xf32, #tpu.memory_space<vmem>>, vector<1x10xf32>
    %c0_14 = arith.constant 0 : index
    %c0_15 = arith.constant 0 : index
    %18 = vector.load %arg2[%c0_14, %c0_15] : memref<784x64xbf16, #tpu.memory_space<vmem>>, vector<784x64xbf16>
    %cst_16 = arith.constant dense<0.000000e+00> : vector<2x64xf32>
    %19 = tpu.matmul %12, %18, %cst_16 {dimension_numbers = #tpu.dot_dimension_numbers<[1], [0], [0], [1], [0, 0, 1, 1], [], []>} : vector<2x784xf32>, vector<784x64xbf16>, vector<2x64xf32> -> vector<2x64xf32>
    %20 = vector.broadcast %14 : vector<1x64xf32> to vector<2x64xf32>
    %21 = arith.addf %19, %20 : vector<2x64xf32>
    %cst_17 = arith.constant 0.000000e+00 : f32
    %22 = vector.broadcast %cst_17 : f32 to vector<2x64xf32>
    %23 = arith.maximumf %21, %22 : vector<2x64xf32>
    %cst_18 = arith.constant dense<0.000000e+00> : vector<2x24xf32>
    %24 = tpu.matmul %23, %13, %cst_18 {dimension_numbers = #tpu.dot_dimension_numbers<[1], [0], [0], [1], [0, 0, 1, 1], [], []>} : vector<2x64xf32>, vector<64x24xf32>, vector<2x24xf32> -> vector<2x24xf32>
    %25 = vector.broadcast %16 : vector<1x24xf32> to vector<2x24xf32>
    %26 = arith.addf %24, %25 : vector<2x24xf32>
    %cst_19 = arith.constant 0.000000e+00 : f32
    %27 = vector.broadcast %cst_19 : f32 to vector<2x24xf32>
    %28 = arith.maximumf %26, %27 : vector<2x24xf32>
    %cst_20 = arith.constant dense<0.000000e+00> : vector<2x10xf32>
    %29 = tpu.matmul %28, %15, %cst_20 {dimension_numbers = #tpu.dot_dimension_numbers<[1], [0], [0], [1], [0, 0, 1, 1], [], []>} : vector<2x24xf32>, vector<24x10xf32>, vector<2x10xf32> -> vector<2x10xf32>
    %30 = vector.broadcast %17 : vector<1x10xf32> to vector<2x10xf32>
    %31 = arith.addf %29, %30 : vector<2x10xf32>
    %c0_21 = arith.constant 0 : index
    %c0_22 = arith.constant 0 : index
    %32 = vector.load %arg4[%c0_21, %c0_22] : memref<2x10xf32, #tpu.memory_space<vmem>>, vector<2x10xf32>
    tpu.vector_store %arg4[%c0_21, %c0_22], %31 {strides = array<i32>} : memref<2x10xf32, #tpu.memory_space<vmem>>, vector<2x10xf32>,
    return
  }
  func.func @transform_0(%arg0: i32) -> (i32, i32, i32) {
    %c0_i32 = arith.constant 0 : i32
    %c0_i32_0 = arith.constant 0 : i32
    %c0_i32_1 = arith.constant 0 : i32
    %c0_i32_2 = arith.constant 0 : i32
    return %c0_i32, %c0_i32_0, %c0_i32_1 : i32, i32, i32
  }
  func.func @transform_1(%arg0: i32) -> (i32, i32) {
    %c0_i32 = arith.constant 0 : i32
    %c0_i32_0 = arith.constant 0 : i32
    %c0_i32_1 = arith.constant 0 : i32
    return %c0_i32, %c0_i32_0 : i32, i32
  }
  func.func @transform_2(%arg0: i32) -> (i32, i32) {
    %c0_i32 = arith.constant 0 : i32
    %c0_i32_0 = arith.constant 0 : i32
    %c0_i32_1 = arith.constant 0 : i32
    return %c0_i32, %c0_i32_0 : i32, i32
  }
  func.func @transform_3(%arg0: i32) -> (i32, i32) {
    %c0_i32 = arith.constant 0 : i32
    %c0_i32_0 = arith.constant 0 : i32
    %c0_i32_1 = arith.constant 0 : i32
    return %c0_i32, %c0_i32_0 : i32, i32
  }
}

</mosaic_0001>

<bundles_post_ra>
// kernel: tpu_custom_call.1
= control target key start
LH: loop header
LB: loop body
LE: loop exit
PB: predicated region body
PF: predicated region fallthrough
CT: control target
= control target key end

     0   :  { %v157_v29 = vlaneseq  ;;  %v1074_v37 = vmov 1983009808   ;;  %v1075_v46 = vmov 0.0   ;;  %vm1076_vm0 = vmmov 0   ;;  %s1332_s0 = inlined_call_operand.vmem [shape: f32[4,2,784], index: 0, kind: input, shape index: {}]   ;;  %s1333_s1 = inlined_call_operand.vmem [shape: bf16[784,64], index: 1, kind: input, shape index: {}]   ;;  %s1334_s2 = inlined_call_operand.vmem [shape: f32[104,64], index: 2, kind: input, shape index: {}]   ;;  %s1335_s3 = inlined_call_operand.hbm [shape: f32[2,10], index: 3, kind: output, shape index: {}]  }
   0x1   :  { %v1001_v0 = vld [vmem:[%s1333_s1 + $0x40] sm:$0xff]   ;;  %v1005_v4 = vld [vmem:[%s1333_s1 + $0x48] sm:$0xff]   ;;  %v1009_v8 = vld [vmem:[%s1333_s1 + $0x50] sm:$0xff]   ;;  %v155_v38 = vunpack.c.l.s4 %v1074_v37 }
   0x2   :  { %v1002_v1 = vld [vmem:[%s1333_s1] sm:$0xff]   ;;  %876 = vmatprep.subr.bf16.mxu0 %v1001_v0  ;;  %v1006_v5 = vld [vmem:[%s1333_s1 + $0x8] sm:$0xff]   ;;  %v1010_v9 = vld [vmem:[%s1333_s1 + $0x10] sm:$0xff]   ;;  %v158_v39 = vshrl.u32 %v157_v29, 7 }
   0x3   :  { %v1003_v2 = vld [vmem:[%s1333_s1 + $0xc0] sm:$0xff]   ;;  %877 = vmatpush3.bf16.msra.mxu0 %v1002_v1  ;;  %v1007_v6 = vld [vmem:[%s1333_s1 + $0xc8] sm:$0xff]   ;;  %v1011_v10 = vld [vmem:[%s1333_s1 + $0xd0] sm:$0xff]   ;;  %v156_v42 = vunpack.c.0.s8 %v155_v38 }
   0x4   :  { %v1004_v3 = vld [vmem:[%s1333_s1 + $0x80] sm:$0xff]   ;;  %895 = vmatprep.subr.bf16.mxu1 %v1003_v2  ;;  %878 = vmatprep.subr.bf16.mxu0 %v1005_v4  ;;  %v1008_v7 = vld [vmem:[%s1333_s1 + $0x88] sm:$0xff]   ;;  %v1012_v11 = vld [vmem:[%s1333_s1 + $0x90] sm:$0xff]  }
   0x5   :  { %896 = vmatpush3.bf16.msra.mxu1 %v1004_v3  ;;  %v1013_v12 = vld [vmem:[%s1333_s1 + $0x58] sm:$0xff]   ;;  %v1017_v16 = vld [vmem:[%s1333_s1 + $0x60] sm:$0xff]   ;;  %v1021_v20 = vld [vmem:[%s1333_s1 + $0x68] sm:$0xff]   ;;  %v159_v45 = vsub.s32 %v156_v42, %v158_v39 }
   0x6   :  { %897 = vmatprep.subr.bf16.mxu1 %v1007_v6  ;;  %v1014_v13 = vld [vmem:[%s1333_s1 + $0x18] sm:$0xff]   ;;  %v1018_v17 = vld [vmem:[%s1333_s1 + $0x20] sm:$0xff]   ;;  %v1022_v21 = vld [vmem:[%s1333_s1 + $0x28] sm:$0xff]  }
   0x7   :  { %879 = vmatpush3.bf16.msra.mxu0 %v1006_v5  ;;  %v1015_v14 = vld [vmem:[%s1333_s1 + $0xd8] sm:$0xff]   ;;  %v1019_v18 = vld [vmem:[%s1333_s1 + $0xe0] sm:$0xff]   ;;  %v1023_v22 = vld [vmem:[%s1333_s1 + $0xe8] sm:$0xff]  }
   0x8   :  { %880 = vmatprep.subr.bf16.mxu0 %v1009_v8  ;;  %v1016_v15 = vld [vmem:[%s1333_s1 + $0x98] sm:$0xff]   ;;  %v1020_v19 = vld [vmem:[%s1333_s1 + $0xa0] sm:$0xff]   ;;  %v1024_v23 = vld [vmem:[%s1333_s1 + $0xa8] sm:$0xff]  }
   0x9   :  { %898 = vmatpush3.bf16.msra.mxu1 %v1008_v7  ;;  %v1025_v24 = vld [vmem:[%s1333_s1 + $0x70] sm:$0xff]   ;;  %v1029_v28 = vld [vmem:[%s1333_s1 + $0x78] sm:$0xff]   ;;  %v16_v32 = vld [vmem:[%s1332_s0] sm:$0xff] }
   0xa   :  { %899 = vmatprep.subr.bf16.mxu1 %v1011_v10  ;;  %v1026_v25 = vld [vmem:[%s1333_s1 + $0x30] sm:$0xff]   ;;  %v1030_v30 = vld [vmem:[%s1333_s1 + $0x38] sm:$0xff]   ;;  %v1033_v43 = vld [vmem:[%s1333_s1 + $0x140] sm:$0xff]  }
   0xb   :  { %881 = vmatpush3.bf16.msra.mxu0 %v1010_v9  ;;  %v1027_v26 = vld [vmem:[%s1333_s1 + $0xf0] sm:$0xff]   ;;  %v1031_v31 = vld [vmem:[%s1333_s1 + $0xf8] sm:$0xff]   ;;  %v1034_v52 = vld [vmem:[%s1333_s1 + $0x100] sm:$0xff]  }
   0xc   :  { %882 = vmatprep.subr.bf16.mxu0 %v1013_v12  ;;  %v1028_v27 = vld [vmem:[%s1333_s1 + $0xb0] sm:$0xff]   ;;  %v817_v34 = vld [vmem:[%s1332_s0 + $0x1c] sm:$0xff]  ;;  %v1035_v53 = vld [vmem:[%s1333_s1 + $0x148] sm:$0xff]  }
   0xd   :  { %900 = vmatpush3.bf16.msra.mxu1 %v1012_v11  ;;  %v815_v33 = vld [vmem:[%s1332_s0 + $0xe] sm:$0xff]  ;;  %v1032_v40 = vld [vmem:[%s1333_s1 + $0xb8] sm:$0xff]   ;;  %v17_v59 = vld [vmem:[%s1332_s0 + $0x8] sm:$0x3f] }
   0xe   :  { %901 = vmatprep.subr.bf16.mxu1 %v1015_v14  ;;  %v21_v35 = vadd.f32 %v815_v33, %v16_v32  ;;  %v819_v36 = vld [vmem:[%s1332_s0 + $0x2a] sm:$0xff]  ;;  %v1039_v58 = vld [vmem:[%s1333_s1 + $0x158] sm:$0xff]   ;;  %v818_v62 = vld [vmem:[%s1332_s0 + $0x24] sm:$0x3f] }
   0xf   :  { %883 = vmatpush3.bf16.msra.mxu0 %v1014_v13  ;;  %v1036_v55 = vld [vmem:[%s1333_s1 + $0x108] sm:$0xff]   ;;  %v1037_v56 = vld [vmem:[%s1333_s1 + $0x150] sm:$0xff]   ;;  %v1049_v0 = vld [vmem:[%s1333_s1 + $0x180] sm:$0xff]  }
  0x10   :  { %884 = vmatprep.subr.bf16.mxu0 %v1017_v16  ;;  %v26_v41 = vadd.f32 %v817_v34, %v21_v35  ;;  %v1038_v57 = vld [vmem:[%s1333_s1 + $0x110] sm:$0xff]  }
  0x11   :  { %902 = vmatpush3.bf16.msra.mxu1 %v1016_v15  ;;  %v816_v60 = vld [vmem:[%s1332_s0 + $0x16] sm:$0x3f] }
  0x12   :  { %903 = vmatprep.subr.bf16.mxu1 %v1019_v18  ;;  %v31_v44 = vadd.f32 %v819_v36, %v26_v41  ;;  %v22_v61 = vadd.f32 %v816_v60, %v17_v59  ;;  %v820_v63 = vld [vmem:[%s1332_s0 + $0x32] sm:$0x3f] }
  0x13   :  { %885 = vmatpush3.bf16.msra.mxu0 %v1018_v17 }
  0x14   :  { %886 = vmatprep.subr.bf16.mxu0 %v1021_v20  ;;  %v33_v47 = vmul.f32 0.25, %v31_v44 }
  0x15   :  { %904 = vmatpush3.bf16.msra.mxu1 %v1020_v19 }
  0x16   :  { %905 = vmatprep.subr.bf16.mxu1 %v1023_v22  ;;  %v160_v48 = vrot.slane %v33_v47, %v159_v45  ;;  %v153_v49 = vcombine.high %v33_v47, %v33_v47 }
  0x17   :  { %887 = vmatpush3.bf16.msra.mxu0 %v1022_v21 }
  0x18   :  { %888 = vmatprep.subr.bf16.mxu0 %v1025_v24  ;;  %v168_v50 = vcombine.high %v160_v48, %v160_v48  ;;  %v167_v51 = vrot.slane %v153_v49, %v159_v45 }
  0x19   :  { %906 = vmatpush3.bf16.msra.mxu1 %v1024_v23 }
  0x1a   :  { %907 = vmatprep.subr.bf16.mxu1 %v1027_v26  ;;  %521 = vmatprep.mubr.f32.mxu0 %v168_v50  ;;  %v169_v54 = vcombine.high %v167_v51, %v167_v51 }
  0x1b   :  { %889 = vmatpush3.bf16.msra.mxu0 %v1026_v25 }
  0x1c   :  { %890 = vmatprep.subr.bf16.mxu0 %v1029_v28  ;;  %559 = vmatprep.mubr.f32.mxu1 %v169_v54 }
  0x1d   :  { %908 = vmatpush3.bf16.msra.mxu1 %v1028_v27 }
  0x1e   :  { %909 = vmatprep.subr.bf16.mxu1 %v1031_v31 }
  0x1f   :  { %891 = vmatpush3.bf16.msra.mxu0 %v1030_v30 }
  0x20   :  { %914 = vmatprep.subr.bf16.mxu0 %v1033_v43 }
  0x21   :  { %910 = vmatpush3.bf16.msra.mxu1 %v1032_v40 }
  0x22   :  { %948 = vmatprep.subr.bf16.mxu1 %v1075_v46  ;;  %522 = vmatmul.mubr.f32.vlgmr.msra.gmra.mrb[0].mxu0 %v160_v48 }
  0x23   :  { %915 = vmatpush3.bf16.msra.mxu0 %v1034_v52 }
  0x24   :  { %560 = vmatmul.mubr.f32.vlgmr.msra.gmra.mrb[0].mxu1 %v167_v51  ;;  %916 = vmatprep.subr.bf16.mxu0 %v1035_v53 }
  0x25   :  { %950 = vmatprep.mubr.msk.f32.mxu1 %vm1076_vm0, %v1075_v46 }
  0x27   :  { %917 = vmatpush3.bf16.msra.mxu0 %v1036_v55 }
  0x28   :  { %918 = vmatprep.subr.bf16.mxu0 %v1037_v56 }
  0x29   :  { %8 = vsyncpa [#allocation3], 0  ;;  %v27_v1 = vadd.f32 %v818_v62, %v22_v61  ;;  %949 = vmatpush3.bf16.msra.mxu1 %v1049_v0  ;;  %v1040_v2 = vld [vmem:[%s1333_s1 + $0x118] sm:$0xff]   ;;  %v1041_v4 = vld [vmem:[%s1333_s1 + $0x160] sm:$0xff]   ;;  %vm486_vm1 = vcmask 130048   ;;  %v1077_v20 = vmov 0.0|0.0  }
  0x2a   :  { %v1042_v6 = vld [vmem:[%s1333_s1 + $0x120] sm:$0xff]   ;;  %v1043_v9 = vld [vmem:[%s1333_s1 + $0x168] sm:$0xff]   ;;  %v1045_v13 = vld [vmem:[%s1333_s1 + $0x170] sm:$0xff]   ;;  %981 = vmatprep.subr.bf16.mxu1 %v1077_v20  ;;  %vm646_vm2 = vcmask 523264   ;;  %vm725_vm3 = vcmask 195584   ;;  %s1078_s16 = smov [#allocation2]  }
  0x2b   :  { %919 = vmatpush3.bf16.msra.mxu0 %v1038_v57  ;;  %v32_v3 = vadd.f32 %v820_v63, %v27_v1  ;;  %v1044_v12 = vld [vmem:[%s1333_s1 + $0x128] sm:$0xff]   ;;  %v1046_v14 = vld [vmem:[%s1333_s1 + $0x130] sm:$0xff]   ;;  %v1047_v15 = vld [vmem:[%s1333_s1 + $0x178] sm:$0xff]   ;;  %s807_s17 = sshll.u32 %s1078_s16, 4  ;;  %vm799_vm4 = vcmask 74752   ;;  %s808_s17 = int_to_ptr.vmem [resolvable:$true] %s807_s17 }
  0x2c   :  { %920 = vmatprep.subr.bf16.mxu0 %v1039_v58  ;;  %v1048_v16 = vld [vmem:[%s1333_s1 + $0x138] sm:$0xff]   ;;  %v35_v17 = vld [vmem:[%s1334_s2] sm:$0xff]  ;;  %v36_v18 = vld [vmem:[%s1334_s2 + $0x8] sm:$0xff]  ;;  %s1050_s18 = scalar_lea.vmem %s808_s17, 32  ;;  %p1055_p1 = scmp.lt.s32.totalorder %s808_s17, %s808_s17 }
  0x2d   :  { %v34_v5 = vmul.f32 0.25, %v32_v3  ;;  %v37_v19 = vld [vmem:[%s1334_s2 + $0x10] sm:$0xff]  ;;  %v982_v21 = vpack.c.bf16 %v36_v18, %v35_v17  ;;  %v38_v22 = vld [vmem:[%s1334_s2 + $0x18] sm:$0xff]  ;;  %v39_v24 = vld [vmem:[%s1334_s2 + $0x20] sm:$0xff]  ;;  %p1051_p0 = scmp.ne.s32.totalorder %s808_s17, %s1050_s18  ;;  %p1056_p2 = scmp.lt.s32.totalorder %s1050_s18, %s1050_s18 }
  0x2e   :  { %v985_v23 = vpack.c.bf16 %v38_v22, %v37_v19  ;;  %v40_v25 = vld [vmem:[%s1334_s2 + $0x28] sm:$0xff]  ;;  %v41_v27 = vld [vmem:[%s1334_s2 + $0x30] sm:$0xff]  ;;  %v42_v28 = vld [vmem:[%s1334_s2 + $0x38] sm:$0xff] }
  0x2f   :  { %921 = vmatpush3.bf16.msra.mxu0 %v1040_v2  ;;  %v170_v7 = vcombine.high %v34_v5, %v34_v5  ;;  %v177_v8 = vrot.slane %v34_v5, %v159_v45  ;;  %v988_v26 = vpack.c.bf16 %v40_v25, %v39_v24  ;;  %v991_v29 = vpack.c.bf16 %v42_v28, %v41_v27  ;;  %v821_v31 = vld [vmem:[%s1334_s2 + $0x40] ss:$0 sm:$0xff]  ;;  %v45_v47 = vld [vmem:[%s1334_s2 + $0x50] sm:$0xff]  ;;  %v46_v51 = vld [vmem:[%s1334_s2 + $0x58] sm:$0xff]  ;;  %p1057_p3 = por %p1056_p2, %p1055_p1 }
  0x30   :  { %922 = vmatprep.subr.bf16.mxu0 %v1041_v4  ;;  %v872_v52 = vld [vmem:[%s1334_s2 + $0x60] ss:$0 sm:$0xff]  ;;  %v874_v57 = vld [vmem:[%s1334_s2 + $0x61] ss:$0 sm:$0xff] }
  0x31   :  { %v185_v10 = vcombine.high %v177_v8, %v177_v8  ;;  %v184_v11 = vrot.slane %v170_v7, %v159_v45  ;;  %v44_v45 = vld [vmem:[%s1334_s2 + $0x48] sm:$0xff]  ;;  %p1058_p4 = pnand %p1057_p3, %p1051_p0 }
  0x32   :  { %v994_v49 = vpack.c.bf16 %v45_v47, %v44_v45 }
  0x33   :  { %923 = vmatpush3.bf16.msra.mxu0 %v1042_v6  ;;  %597 = vmatprep.mubr.f32.mxu0 %v185_v10 }
  0x34   :  { %924 = vmatprep.subr.bf16.mxu0 %v1043_v9  ;;  %951 = vmatmul.mubr.msk.f32.vlgmr.msra.gmra.mrb[2].mxu1 %vm486_vm1, %v184_v11 }
  0x35   :  { %969 = vmatprep.mubr.msk.f32.mxu1 %vm1076_vm0, %v1075_v46  ;;  %983 = vmatpush3.bf16.msra.mxu1 %v982_v21 }
  0x36   :  { %984 = vmatprep.subr.bf16.mxu1 %v1077_v20 }
  0x37   :  { %925 = vmatpush3.bf16.msra.mxu0 %v1044_v12 }
  0x38   :  { %926 = vmatprep.subr.bf16.mxu0 %v1045_v13 }
  0x39   :  { %986 = vmatpush3.bf16.msra.mxu1 %v985_v23 }
  0x3a   :  { %987 = vmatprep.subr.bf16.mxu1 %v1077_v20 }
  0x3b   :  { %927 = vmatpush3.bf16.msra.mxu0 %v1046_v14 }
  0x3c   :  { %928 = vmatprep.subr.bf16.mxu0 %v1047_v15 }
  0x3d   :  { %989 = vmatpush3.bf16.msra.mxu1 %v988_v26 }
  0x3e   :  { %990 = vmatprep.subr.bf16.mxu1 %v1077_v20 }
  0x3f   :  { %929 = vmatpush3.bf16.msra.mxu0 %v1048_v16 }
  0x41   :  { %992 = vmatpush3.bf16.msra.mxu1 %v991_v29 }
  0x42   :  { %598 = vmatmul.mubr.f32.vlgmr.msra.gmra.mrb[2].mxu0 %v177_v8  ;;  %993 = vmatprep.subr.bf16.mxu1 %v1077_v20 }
  0xf5   :  { %v892_v30 = vpop.f32.mrb[0].mxu0 }
  0xf6   :  { %v893_v32 = vpop.f32.mrb[1].mxu0 }
  0xf7   :  { %v894_v33 = vadd.f32 %v893_v32, %v892_v30  ;;  %v911_v34 = vpop.f32.mrb[0].mxu1 }
  0xf8   :  { %v912_v35 = vpop.f32.mrb[1].mxu1 }
  0xf9   :  { %v524_v36 = vadd.f32 %v894_v33, %v821_v31  ;;  %v913_v37 = vadd.f32 %v912_v35, %v911_v34 }
  0xfb   :  { %v562_v38 = vadd.f32 %v913_v37, %v524_v36 }
 0x107   :  { %v637_v39 = vpop.f32.mrb[2].mxu1 }
 0x108   :  { %v952_v40 = vpop.f32.mrb[3].mxu1 }
 0x115   :  { %v930_v41 = vpop.f32.mrb[2].mxu0 }
 0x116   :  { %v931_v42 = vpop.f32.mrb[3].mxu0 }
 0x117   :  { %v932_v43 = vadd.f32 %v931_v42, %v930_v41 }
 0x119   :  { %v600_v44 = vadd.f32 %v932_v43, %v562_v38 }
 0x11b   :  { %v638_v48 = vadd.f32 %v637_v39, %v600_v44 }
 0x11d   :  { %v641_v50 = vmax.f32 %v638_v48, 0.0 }
 0x11f   :  { %970 = vmatmul.mubr.msk.f32.vlgmr.msra.gmra.mrb[4].mxu1 %vm646_vm2, %v641_v50 }
 0x120   :  { %995 = vmatpush3.bf16.msra.mxu1 %v994_v49  ;;  %978 = vmatprep.mubr.msk.f32.mxu1 %vm1076_vm0, %v1075_v46 }
 0x121   :  { %976 = vmatprep.subr.mxu1 %v1075_v46 }
 0x124   :  { %977 = vmatpush3.msra.mxu1 %v46_v51 }
 0x1f2   :  { %v716_v53 = vpop.f32.mrb[4].mxu1 }
 0x1f3   :  { %v717_v54 = vadd.f32 %v872_v52, %v716_v53  ;;  %v971_v55 = vpop.f32.mrb[5].mxu1 }
 0x1f5   :  { %v720_v56 = vmax.f32 %v717_v54, 0.0 }
 0x1f7   :  { %979 = vmatmul.mubr.msk.f32.vlgmr.msra.gmra.mrb[6].mxu1 %vm725_vm3, %v720_v56 }
 0x2ca   :  { %v795_v46 = vpop.f32.mrb[6].mxu1 }
 0x2cb   :  { %v796_v58 = vadd.f32 %v874_v57, %v795_v46  ;;  %v980_v59 = vpop.f32.mrb[7].mxu1 }
 0x2cd   :  { %800 = vst.msk [vmem:[#allocation2] sm:$0x3] %vm799_vm4, %v796_v58 }
 0x2ce   :  { %1061 = shalt.err (!%p1058_p4)
}
 0x2cf   :  { %s1062_s21 = scalar_lea.hbm %s1335_s3, 32 }
 0x2d0   :  { %p1063_p5 = scmp.ne.s32.totalorder %s1335_s3, %s1062_s21  ;;  %p1066_p6 = scmp.lt.u32.totalorder %s1062_s21, %s1335_s3 }
 0x2d2   :  { %p1068_p7 = pnand %p1066_p6, %p1063_p5 }
 0x2d4   :  { %1071 = shalt.err (!%p1068_p7)
}
 0x2d5   :  { %810 = dma.vmem_to_hbm [thread:$0]  %s808_s17, 32, %s1335_s3, [#allocation3]  }
 0x2d6   :  { %1072 = dma.done.wait [#allocation3], 32  }
 0x2d7   :  { %1073 = vsyncadd [#allocation3], 4294967264 }
 0x2d8   :  { %814 = vsyncpa [#allocation3], 1 }

</bundles_post_ra>
